<compile_context>
chip_gen: v5e
topology: v5e:2x2
jax: 0.10.0
libtpu: 0.0.40
codegen_flags: <defaults>
</compile_context>

<pallas_src>
import functools

import jax
import jax.numpy as jnp
from jax.experimental import pallas as pl
from jax.experimental.pallas import tpu as pltpu

EPS = 1e-5


def fused_sepconv_kernel(x_ref, dw_ref, b1_ref, pw_ref, b2_ref, o_ref, *, k, W):
    """Depthwise kxk conv + folded BN1 + ReLU + 1x1 conv + folded BN2.

    x_ref : (Nb, C, H*W)  VMEM input block, spatial plane flattened on lanes
    dw_ref: (C, k*k)      VMEM BN1-folded depthwise taps (per-channel columns)
    b1_ref: (C, 1)        VMEM BN1-folded bias
    pw_ref: (P, C)        VMEM BN2-folded pointwise weights
    b2_ref: (P, 1)        VMEM BN2-folded bias
    o_ref : (Nb, P, H*W)  VMEM output block (valid outputs at y<Ho, x<Wo only;
                          the wrapper slices them out)
    """
    Nb, C, HW = x_ref.shape
    P = pw_ref.shape[0]

    dw = dw_ref[...]          # (C, k*k) f32
    b1 = b1_ref[...]          # (C, 1)
    pw = pw_ref[...]          # (P, C)
    b2 = b2_ref[...]          # (P, 1)

    for b in range(Nb):       # Nb is tiny and static -> unrolled
        xb = x_ref[b].astype(jnp.float32)            # (C, HW), lane-dense

        # ---- depthwise conv + folded BN1 + ReLU ----------------------------
        # output[p] = sum_{dy,dx} x[p + dy*W + dx] * w[dy,dx].
        # Each tap is one static lane roll of the whole channel slab (XLU)
        # plus one broadcast FMA (VPU).  First tap initializes the accumulator.
        acc = xb * dw[:, 0:1]                         # tap (0,0): offset 0
        for dy in range(k):
            for dx in range(k):
                if dy == 0 and dx == 0:
                    continue
                off = dy * W + dx
                t = dy * k + dx
                shifted = pltpu.roll(xb, shift=HW - off, axis=1)  # x[p+off]
                acc = acc + shifted * dw[:, t:t + 1]
        y = jnp.maximum(acc + b1, 0.0)                # (C, HW)

        # ---- 1x1 pointwise conv + folded BN2 -------------------------------
        # C broadcast FMAs producing the full (P, HW) slab (full vreg util).
        # TODO(synk): for large C/P switch to jnp.dot(pw, y) on the MXU.
        z = y[0:1, :] * pw[:, 0:1]                    # (1,HW)*(P,1) -> (P,HW)
        for c in range(1, C):
            z = z + y[c:c + 1, :] * pw[:, c:c + 1]
        o_ref[b] = (z + b2).astype(o_ref.dtype)       # one dense slab store


def separable_conv2d(x_nchw, dw_weight, bn1, pw_weight, bn2):
    """x_nchw: (N,C,H,W); dw_weight: (C,1,k,k); pw_weight: (P,C,1,1);
    bn1: (4,C) rows [gamma,beta,running_mean,running_var]; bn2: (4,P).
    Returns (N,P,Ho,Wo), matching the PyTorch module with stride=1, padding=0,
    dilation=1, bias=False and eval-mode BatchNorm (eps=1e-5)."""
    N, C, H, W = x_nchw.shape
    k = dw_weight.shape[-1]
    Ho, Wo = H - k + 1, W - k + 1
    P = pw_weight.shape[0]
    HW = H * W

    # ---- fold eval-mode BatchNorm into conv weights & biases ---------------
    gamma1, beta1, mean1, var1 = bn1
    gamma2, beta2, mean2, var2 = bn2
    s1 = gamma1 * jax.lax.rsqrt(var1 + EPS)                      # (C,)
    s2 = gamma2 * jax.lax.rsqrt(var2 + EPS)                      # (P,)
    dw_folded = (dw_weight[:, 0].reshape(C, k * k).astype(jnp.float32)
                 * s1[:, None])                                  # (C, k*k)
    bias1 = (beta1 - mean1 * s1).reshape(C, 1).astype(jnp.float32)
    pw_folded = (pw_weight[:, :, 0, 0].astype(jnp.float32)
                 * s2[:, None])                                  # (P, C)
    bias2 = (beta2 - mean2 * s2).reshape(P, 1).astype(jnp.float32)

    # ---- batch blocking: <=2 fat grid steps --------------------------------
    # 2 steps keeps both v7x TensorCores busy ("parallel") while amortizing
    # per-step overhead on single-TC v5e/v6e.
    if N >= 2 and N % 2 == 0:
        Nb = N // 2
    else:
        Nb = 1
    grid = (N // Nb,)

    # Lane-dense spatial layout: flatten H*W onto the lane axis (free reshape).
    x_flat = x_nchw.reshape(N, C, HW)

    # Derive the VMEM budget from the double-buffered block footprint.
    in_bytes = Nb * C * HW * 4
    out_bytes = Nb * P * HW * 4
    w_bytes = (C * k * k + C + P * C + P) * 4
    vmem_limit = min(32 << 20, max(8 << 20, 4 * (in_bytes + out_bytes + w_bytes)))

    out_flat = pl.pallas_call(
        functools.partial(fused_sepconv_kernel, k=k, W=W),
        out_shape=jax.ShapeDtypeStruct((N, P, HW), x_nchw.dtype),
        grid_spec=pltpu.PrefetchScalarGridSpec(
            num_scalar_prefetch=0,
            grid=grid,
            in_specs=[
                pl.BlockSpec((Nb, C, HW), lambda n: (n, 0, 0)),   # activations
                pl.BlockSpec((C, k * k), lambda n: (0, 0)),       # dw taps
                pl.BlockSpec((C, 1), lambda n: (0, 0)),           # bias1
                pl.BlockSpec((P, C), lambda n: (0, 0)),           # pw weights
                pl.BlockSpec((P, 1), lambda n: (0, 0)),           # bias2
            ],
            out_specs=pl.BlockSpec((Nb, P, HW), lambda n: (n, 0, 0)),
        ),
        compiler_params=pltpu.CompilerParams(
            dimension_semantics=("parallel",),
            vmem_limit_bytes=vmem_limit,
        ),
    )(x_flat, dw_folded, bias1, pw_folded, bias2)

    # Valid conv outputs live at flattened positions y*W+x with y<Ho, x<Wo;
    # lanes outside that window are roll wrap-around garbage -> slice them off.
    return out_flat.reshape(N, P, H, W)[:, :, :Ho, :Wo]


def reference(x_nchw, dw_weight, bn1, pw_weight, bn2):
    """Plain-JAX reference reproducing the PyTorch forward (eval-mode BN)."""
    N, C, H, W = x_nchw.shape
    k = dw_weight.shape[-1]
    Ho, Wo = H - k + 1, W - k + 1
    acc = jnp.zeros((N, C, Ho, Wo), jnp.float32)
    for dy in range(k):
        for dx in range(k):
            acc = acc + x_nchw[:, :, dy:dy + Ho, dx:dx + Wo] * \
                dw_weight[:, 0, dy, dx][None, :, None, None]
    g1, b1, m1, v1 = bn1
    y = (acc - m1[None, :, None, None]) * jax.lax.rsqrt(v1 + EPS)[None, :, None, None] \
        * g1[None, :, None, None] + b1[None, :, None, None]
    y = jnp.maximum(y, 0.0)
    z = jnp.einsum('nchw,pc->nphw', y, pw_weight[:, :, 0, 0])
    g2, b2, m2, v2 = bn2
    z = (z - m2[None, :, None, None]) * jax.lax.rsqrt(v2 + EPS)[None, :, None, None] \
        * g2[None, :, None, None] + b2[None, :, None, None]
    return z


if __name__ == "__main__":
    # Small shapes consistent with the module: SeparableConv2d(inplanes=4, planes=8)
    N, C, H, W = 2, 4, 16, 16
    P, ksz = 8, 3

    key = jax.random.PRNGKey(0)
    kx, kdw, kpw, k1g, k1b, k1m, k1v, k2g, k2b, k2m, k2v = jax.random.split(key, 11)

    x = jax.random.normal(kx, (N, C, H, W), jnp.float32)
    dw_weight = jax.random.normal(kdw, (C, 1, ksz, ksz), jnp.float32) * 0.2   # depthwise
    pw_weight = jax.random.normal(kpw, (P, C, 1, 1), jnp.float32) * 0.2       # pointwise 1x1

    bn1 = jnp.stack([
        1.0 + 0.1 * jax.random.normal(k1g, (C,), jnp.float32),   # gamma
        0.1 * jax.random.normal(k1b, (C,), jnp.float32),         # beta
        0.1 * jax.random.normal(k1m, (C,), jnp.float32),         # running_mean
        0.5 + jax.random.uniform(k1v, (C,), jnp.float32),        # running_var (>0)
    ])
    bn2 = jnp.stack([
        1.0 + 0.1 * jax.random.normal(k2g, (P,), jnp.float32),
        0.1 * jax.random.normal(k2b, (P,), jnp.float32),
        0.1 * jax.random.normal(k2m, (P,), jnp.float32),
        0.5 + jax.random.uniform(k2v, (P,), jnp.float32),
    ])

    out = separable_conv2d(x, dw_weight, bn1, pw_weight, bn2)
    out = jax.block_until_ready(out)

    ref = jax.block_until_ready(reference(x, dw_weight, bn1, pw_weight, bn2))
    assert out.shape == (N, P, H - ksz + 1, W - ksz + 1), out.shape
    assert jnp.allclose(out, ref, atol=1e-4, rtol=1e-4), \
        float(jnp.max(jnp.abs(out - ref)))

    print("KERNEL_OK")
</pallas_src>

<mosaic_0001>
module attributes {stable_mosaic.version = 11 : i64} {
  func.func @fused_sepconv_kernel(%arg0: i32, %arg1: memref<1x4x256xf32, #tpu.memory_space<vmem>>, %arg2: memref<4x9xf32, #tpu.memory_space<vmem>>, %arg3: memref<4x1xf32, #tpu.memory_space<vmem>>, %arg4: memref<8x4xf32, #tpu.memory_space<vmem>>, %arg5: memref<8x1xf32, #tpu.memory_space<vmem>>, %arg6: memref<1x8x256xf32, #tpu.memory_space<vmem>>) attributes {dimension_semantics = [#tpu.dimension_semantics<parallel>], iteration_bounds = array<i64: 2>, scalar_prefetch = 0 : i64, scratch_operands = 0 : i64, tpu.core_type = #tpu.core_type<tc>, window_params = [{transform_indices = @transform_0, window_bounds = array<i64: 1, 4, 256>}, {pipeline_mode = #tpu.pipeline_mode<synchronous>, transform_indices = @transform_1, window_bounds = array<i64: 4, 9>}, {pipeline_mode = #tpu.pipeline_mode<synchronous>, transform_indices = @transform_2, window_bounds = array<i64: 4, 1>}, {pipeline_mode = #tpu.pipeline_mode<synchronous>, transform_indices = @transform_3, window_bounds = array<i64: 8, 4>}, {pipeline_mode = #tpu.pipeline_mode<synchronous>, transform_indices = @transform_4, window_bounds = array<i64: 8, 1>}, {transform_indices = @transform_5, window_bounds = array<i64: 1, 8, 256>}]} {
    %c0 = arith.constant 0 : index
    %c0_0 = arith.constant 0 : index
    %0 = vector.load %arg2[%c0, %c0_0] : memref<4x9xf32, #tpu.memory_space<vmem>>, vector<4x9xf32>
    %c0_1 = arith.constant 0 : index
    %c0_2 = arith.constant 0 : index
    %1 = vector.load %arg3[%c0_1, %c0_2] : memref<4x1xf32, #tpu.memory_space<vmem>>, vector<4x1xf32>
    %c0_3 = arith.constant 0 : index
    %c0_4 = arith.constant 0 : index
    %2 = vector.load %arg4[%c0_3, %c0_4] : memref<8x4xf32, #tpu.memory_space<vmem>>, vector<8x4xf32>
    %c0_5 = arith.constant 0 : index
    %c0_6 = arith.constant 0 : index
    %3 = vector.load %arg5[%c0_5, %c0_6] : memref<8x1xf32, #tpu.memory_space<vmem>>, vector<8x1xf32>
    %c0_7 = arith.constant 0 : index
    %c0_8 = arith.constant 0 : index
    %c0_9 = arith.constant 0 : index
    %4 = vector.load %arg1[%c0_7, %c0_8, %c0_9] : memref<1x4x256xf32, #tpu.memory_space<vmem>>, vector<1x4x256xf32>
    %5 = vector.shape_cast %4 : vector<1x4x256xf32> to vector<4x256xf32>
    %6 = vector.extract_strided_slice %0 {offsets = [0, 0], sizes = [4, 1], strides = [1, 1]} : vector<4x9xf32> to vector<4x1xf32>
    %7 = vector.broadcast %6 : vector<4x1xf32> to vector<4x256xf32>
    %8 = arith.mulf %5, %7 : vector<4x256xf32>
    %c255_i32 = arith.constant 255 : i32
    %9 = tpu.dynamic_rotate %5 by %c255_i32 dim 1 : vector<4x256xf32>, i32 -> vector<4x256xf32>
    %10 = vector.extract_strided_slice %0 {offsets = [0, 1], sizes = [4, 1], strides = [1, 1]} : vector<4x9xf32> to vector<4x1xf32>
    %11 = vector.broadcast %10 : vector<4x1xf32> to vector<4x256xf32>
    %12 = arith.mulf %9, %11 : vector<4x256xf32>
    %13 = arith.addf %8, %12 : vector<4x256xf32>
    %c254_i32 = arith.constant 254 : i32
    %14 = tpu.dynamic_rotate %5 by %c254_i32 dim 1 : vector<4x256xf32>, i32 -> vector<4x256xf32>
    %15 = vector.extract_strided_slice %0 {offsets = [0, 2], sizes = [4, 1], strides = [1, 1]} : vector<4x9xf32> to vector<4x1xf32>
    %16 = vector.broadcast %15 : vector<4x1xf32> to vector<4x256xf32>
    %17 = arith.mulf %14, %16 : vector<4x256xf32>
    %18 = arith.addf %13, %17 : vector<4x256xf32>
    %c240_i32 = arith.constant 240 : i32
    %19 = tpu.dynamic_rotate %5 by %c240_i32 dim 1 : vector<4x256xf32>, i32 -> vector<4x256xf32>
    %20 = vector.extract_strided_slice %0 {offsets = [0, 3], sizes = [4, 1], strides = [1, 1]} : vector<4x9xf32> to vector<4x1xf32>
    %21 = vector.broadcast %20 : vector<4x1xf32> to vector<4x256xf32>
    %22 = arith.mulf %19, %21 : vector<4x256xf32>
    %23 = arith.addf %18, %22 : vector<4x256xf32>
    %c239_i32 = arith.constant 239 : i32
    %24 = tpu.dynamic_rotate %5 by %c239_i32 dim 1 : vector<4x256xf32>, i32 -> vector<4x256xf32>
    %25 = vector.extract_strided_slice %0 {offsets = [0, 4], sizes = [4, 1], strides = [1, 1]} : vector<4x9xf32> to vector<4x1xf32>
    %26 = vector.broadcast %25 : vector<4x1xf32> to vector<4x256xf32>
    %27 = arith.mulf %24, %26 : vector<4x256xf32>
    %28 = arith.addf %23, %27 : vector<4x256xf32>
    %c238_i32 = arith.constant 238 : i32
    %29 = tpu.dynamic_rotate %5 by %c238_i32 dim 1 : vector<4x256xf32>, i32 -> vector<4x256xf32>
    %30 = vector.extract_strided_slice %0 {offsets = [0, 5], sizes = [4, 1], strides = [1, 1]} : vector<4x9xf32> to vector<4x1xf32>
    %31 = vector.broadcast %30 : vector<4x1xf32> to vector<4x256xf32>
    %32 = arith.mulf %29, %31 : vector<4x256xf32>
    %33 = arith.addf %28, %32 : vector<4x256xf32>
    %c224_i32 = arith.constant 224 : i32
    %34 = tpu.dynamic_rotate %5 by %c224_i32 dim 1 : vector<4x256xf32>, i32 -> vector<4x256xf32>
    %35 = vector.extract_strided_slice %0 {offsets = [0, 6], sizes = [4, 1], strides = [1, 1]} : vector<4x9xf32> to vector<4x1xf32>
    %36 = vector.broadcast %35 : vector<4x1xf32> to vector<4x256xf32>
    %37 = arith.mulf %34, %36 : vector<4x256xf32>
    %38 = arith.addf %33, %37 : vector<4x256xf32>
    %c223_i32 = arith.constant 223 : i32
    %39 = tpu.dynamic_rotate %5 by %c223_i32 dim 1 : vector<4x256xf32>, i32 -> vector<4x256xf32>
    %40 = vector.extract_strided_slice %0 {offsets = [0, 7], sizes = [4, 1], strides = [1, 1]} : vector<4x9xf32> to vector<4x1xf32>
    %41 = vector.broadcast %40 : vector<4x1xf32> to vector<4x256xf32>
    %42 = arith.mulf %39, %41 : vector<4x256xf32>
    %43 = arith.addf %38, %42 : vector<4x256xf32>
    %c222_i32 = arith.constant 222 : i32
    %44 = tpu.dynamic_rotate %5 by %c222_i32 dim 1 : vector<4x256xf32>, i32 -> vector<4x256xf32>
    %45 = vector.extract_strided_slice %0 {offsets = [0, 8], sizes = [4, 1], strides = [1, 1]} : vector<4x9xf32> to vector<4x1xf32>
    %46 = vector.broadcast %45 : vector<4x1xf32> to vector<4x256xf32>
    %47 = arith.mulf %44, %46 : vector<4x256xf32>
    %48 = arith.addf %43, %47 : vector<4x256xf32>
    %49 = vector.broadcast %1 : vector<4x1xf32> to vector<4x256xf32>
    %50 = arith.addf %48, %49 : vector<4x256xf32>
    %cst = arith.constant 0.000000e+00 : f32
    %51 = vector.broadcast %cst : f32 to vector<4x256xf32>
    %52 = arith.maximumf %50, %51 : vector<4x256xf32>
    %53 = vector.extract_strided_slice %52 {offsets = [0, 0], sizes = [1, 256], strides = [1, 1]} : vector<4x256xf32> to vector<1x256xf32>
    %54 = vector.extract_strided_slice %2 {offsets = [0, 0], sizes = [8, 1], strides = [1, 1]} : vector<8x4xf32> to vector<8x1xf32>
    %55 = vector.broadcast %53 : vector<1x256xf32> to vector<8x256xf32>
    %56 = vector.broadcast %54 : vector<8x1xf32> to vector<8x256xf32>
    %57 = arith.mulf %55, %56 : vector<8x256xf32>
    %58 = vector.extract_strided_slice %52 {offsets = [1, 0], sizes = [1, 256], strides = [1, 1]} : vector<4x256xf32> to vector<1x256xf32>
    %59 = vector.extract_strided_slice %2 {offsets = [0, 1], sizes = [8, 1], strides = [1, 1]} : vector<8x4xf32> to vector<8x1xf32>
    %60 = vector.broadcast %58 : vector<1x256xf32> to vector<8x256xf32>
    %61 = vector.broadcast %59 : vector<8x1xf32> to vector<8x256xf32>
    %62 = arith.mulf %60, %61 : vector<8x256xf32>
    %63 = arith.addf %57, %62 : vector<8x256xf32>
    %64 = vector.extract_strided_slice %52 {offsets = [2, 0], sizes = [1, 256], strides = [1, 1]} : vector<4x256xf32> to vector<1x256xf32>
    %65 = vector.extract_strided_slice %2 {offsets = [0, 2], sizes = [8, 1], strides = [1, 1]} : vector<8x4xf32> to vector<8x1xf32>
    %66 = vector.broadcast %64 : vector<1x256xf32> to vector<8x256xf32>
    %67 = vector.broadcast %65 : vector<8x1xf32> to vector<8x256xf32>
    %68 = arith.mulf %66, %67 : vector<8x256xf32>
    %69 = arith.addf %63, %68 : vector<8x256xf32>
    %70 = vector.extract_strided_slice %52 {offsets = [3, 0], sizes = [1, 256], strides = [1, 1]} : vector<4x256xf32> to vector<1x256xf32>
    %71 = vector.extract_strided_slice %2 {offsets = [0, 3], sizes = [8, 1], strides = [1, 1]} : vector<8x4xf32> to vector<8x1xf32>
    %72 = vector.broadcast %70 : vector<1x256xf32> to vector<8x256xf32>
    %73 = vector.broadcast %71 : vector<8x1xf32> to vector<8x256xf32>
    %74 = arith.mulf %72, %73 : vector<8x256xf32>
    %75 = arith.addf %69, %74 : vector<8x256xf32>
    %76 = vector.broadcast %3 : vector<8x1xf32> to vector<8x256xf32>
    %77 = arith.addf %75, %76 : vector<8x256xf32>
    %c0_10 = arith.constant 0 : index
    %c0_11 = arith.constant 0 : index
    %c0_12 = arith.constant 0 : index
    %78 = vector.load %arg6[%c0_10, %c0_11, %c0_12] : memref<1x8x256xf32, #tpu.memory_space<vmem>>, vector<1x8x256xf32>
    %79 = vector.shape_cast %78 : vector<1x8x256xf32> to vector<8x256xf32>
    %80 = vector.shape_cast %77 : vector<8x256xf32> to vector<1x8x256xf32>
    tpu.vector_store %arg6[%c0_10, %c0_11, %c0_12], %80 {strides = array<i32>} : memref<1x8x256xf32, #tpu.memory_space<vmem>>, vector<1x8x256xf32>,
    return
  }
  func.func @transform_0(%arg0: i32) -> (i32, i32, i32) {
    %c0_i32 = arith.constant 0 : i32
    %c0_i32_0 = arith.constant 0 : i32
    %c0_i32_1 = arith.constant 0 : i32
    return %arg0, %c0_i32, %c0_i32_0 : i32, i32, i32
  }
  func.func @transform_1(%arg0: i32) -> (i32, i32) {
    %c0_i32 = arith.constant 0 : i32
    %c0_i32_0 = arith.constant 0 : i32
    %c0_i32_1 = arith.constant 0 : i32
    return %c0_i32, %c0_i32_0 : i32, i32
  }
  func.func @transform_2(%arg0: i32) -> (i32, i32) {
    %c0_i32 = arith.constant 0 : i32
    %c0_i32_0 = arith.constant 0 : i32
    %c0_i32_1 = arith.constant 0 : i32
    return %c0_i32, %c0_i32_0 : i32, i32
  }
  func.func @transform_3(%arg0: i32) -> (i32, i32) {
    %c0_i32 = arith.constant 0 : i32
    %c0_i32_0 = arith.constant 0 : i32
    %c0_i32_1 = arith.constant 0 : i32
    return %c0_i32, %c0_i32_0 : i32, i32
  }
  func.func @transform_4(%arg0: i32) -> (i32, i32) {
    %c0_i32 = arith.constant 0 : i32
    %c0_i32_0 = arith.constant 0 : i32
    %c0_i32_1 = arith.constant 0 : i32
    return %c0_i32, %c0_i32_0 : i32, i32
  }
  func.func @transform_5(%arg0: i32) -> (i32, i32, i32) {
    %c0_i32 = arith.constant 0 : i32
    %c0_i32_0 = arith.constant 0 : i32
    %c0_i32_1 = arith.constant 0 : i32
    return %arg0, %c0_i32, %c0_i32_0 : i32, i32, i32
  }
}

</mosaic_0001>

<bundles_post_ra>
// kernel: tpu_custom_call.1
= control target key start
LH: loop header
LB: loop body
LE: loop exit
PB: predicated region body
PF: predicated region fallthrough
CT: control target
= control target key end

     0   :  { %10 = vsyncpa [#allocation3], 0  ;;  %s964_s0 = inlined_call_operand.vmem [shape: f32[2,4,256], index: 0, kind: input, shape index: {}]   ;;  %s965_s1 = inlined_call_operand.vmem [shape: f32[4,9], index: 1, kind: input, shape index: {}]   ;;  %s966_s2 = inlined_call_operand.vmem [shape: f32[4,1], index: 2, kind: input, shape index: {}]   ;;  %s967_s3 = inlined_call_operand.vmem [shape: f32[8,4], index: 3, kind: input, shape index: {}]   ;;  %s968_s4 = inlined_call_operand.vmem [shape: f32[8,1], index: 4, kind: input, shape index: {}]   ;;  %s969_s5 = inlined_call_operand.hbm [shape: f32[2,8,256], index: 5, kind: output, shape index: {}]  }
   0x1   :  { %12 = vsyncpa [#allocation3 + $0x1], 0  ;;  %s783_s18 = smov 0   ;;  %s785_s19 = smov 0  }
   0x2   :  { %s787_s20 = smov 0   ;;  %s789_s21 = smov 0  }
   0x3 LB: > { %s804_s22 = sadd.s32 4294967295, %s733_s21   ;;  %s586_s23 = sadd.s32 4294967294, %s733_s21   ;;  %s733_s21 = sphi %s789_s21, %s975_s21   ;;  %s729_s20 = sphi %s787_s20, %s974_s20   ;;  %s725_s19 = sphi %s785_s19, %s973_s19   ;;  %s721_s18 = sphi %s783_s18, %s972_s18  }
   0x4   : > { %s808_s24 = sadd.s32 1, %s733_s21   ;;  %s135_s25 = sadd.s32 1, %s729_s20 }
   0x5   : > { %s132_s26 = ssub.s32 %s733_s21, %s808_s24  ;;  %p145_p0 = scmp.ne.s32.totalorder %s729_s20, %s725_s19 }
   0x6   : > { %p133_p1 = scmp.eq.s32.totalorder %s132_s26, 0  ;;  %p146_p2 = scmp.eq.s32.totalorder %s804_s22, 1 }
   0x7   : > { %p151_p3 = scmp.ne.s32.totalorder %s725_s19, %s721_s18  ;;  %p152_p4 = scmp.eq.s32.totalorder %s586_s23, 1 }
   0x8   : > { %s819_s27 = scalar_select %p133_p1, %s729_s20, %s135_s25  }
   0x9   : > { %p821_p5 = por %p146_p2, %p145_p0  ;;  %p825_p6 = por %p152_p4, %p151_p3 }
   0xa   : > { %p589_p7 = scmp.ge.s32.totalorder %s733_s21, 1  ;;  %p190_p8 = scmp.lt.s32.totalorder %s733_s21, 3 }
   0xc   : > { %p191_p9 = pnand %p589_p7, %p190_p8 }
   0xd   : > { %p218_p10 = scmp.lt.s32.totalorder (!%p191_p9), %s804_s22, 1  ;;  %s739_s12 = smov (!%p191_p9), 127  }
   0xe   : > { %194 = sbr.rel (%p191_p9) target bundleno = 236 (0xec), region = 40  ;;  %s740_s13 = smov (!%p191_p9), 126  }
   0xf   : > { %s741_s14 = smov (!%p191_p9), 112   ;;  %s743_s15 = smov (!%p191_p9), 111  }
  0x10   : > { %s745_s16 = smov (!%p191_p9), 110   ;;  %s747_s17 = smov (!%p191_p9), 96  }
  0x11   : > { %s748_s23 = smov (!%p191_p9), 95   ;;  %s750_s25 = smov (!%p191_p9), 94  }
  0x12   : > { %s215_s10 = sand.u32 (!%p191_p9), 1, %s725_s19  }
  0x13   : > { %v834_v0 = vld [vmem:[%s965_s1] sm:$0xf]  ;;  %v735_v1 = vmov 1   ;;  %v736_v2 = vmov 2   ;;  %s219_s7 = scalar_select %p218_p10, %s804_s22, 1  ;;  %v737_v3 = vmov 0   ;;  %v248_v42 = vlaneseq }
  0x14   : > { %657 = vset.pattern.permute.xlu1 %v735_v1  ;;  %658 = vset.pattern.permute.xlu0 %v736_v2  ;;  %v738_v5 = vmov 3   ;;  %v742_v12 = vmov 4   ;;  %v744_v17 = vmov 5   ;;  %v746_v20 = vmov 6   ;;  %v225_v26 = vld [vmem:[%s967_s3] sm:$0xff] }
  0x15   : > { %254 = vperm.xlu1 %657, %v834_v0   ;;  %666 = vset.pattern.permute.xlu2 %v737_v3  ;;  %s598_s8 = sshll.u32 %s219_s7, 3  ;;  %v749_v23 = vmov 7   ;;  %v751_v25 = vmov 8   ;;  %v224_v28 = vld [vmem:[%s966_s2] sm:$0xf]  ;;  %v878_v45 = vand.u32 127, %v248_v42 }
  0x16   : > { %s222_s11 = scalar_lea.vmem %s964_s0, %s598_s8  ;;  %v226_v29 = vld [vmem:[%s968_s4] sm:$0xff]  ;;  %v752_v47 = vmov 839922192   ;;  %vm262_vm4 = vcmask 1043456   ;;  %s691_s7 = scalar_lea.hbm %s969_s5, 32 }
  0x17   : > { %v845_v4 = vld [vmem:[%s222_s11] sm:$0xff]  ;;  %vm250_vm0 = vcmp.lt.s32.totalorder %v878_v45, 127  ;;  %v881_v48 = vunpack.c.l.s4 %v752_v47  ;;  %vm275_vm1 = vcmp.lt.s32.totalorder %v878_v45, 126  ;;  %vm299_vm2 = vcmp.lt.s32.totalorder %v878_v45, 112  ;;  %s590_s11 = sshll.u32 %s215_s10, 4 }
  0x18   : > { %239 = vst [vmem:[#allocation1] ss:$2 sm:$0xff] %v845_v4  ;;  %vm323_vm3 = vcmp.lt.s32.totalorder %v878_v45, 111  ;;  %vm347_vm5 = vcmp.lt.s32.totalorder %v878_v45, 110  ;;  %vm371_vm6 = vcmp.lt.s32.totalorder %v878_v45, 96  ;;  %vm395_vm7 = vcmp.lt.s32.totalorder %v878_v45, 95 }
  0x19   : > { %v234_v52 = vunpack.c.0.s8 %v881_v48  ;;  %vm419_vm8 = vcmp.lt.s32.totalorder %v878_v45, 94 }
  0x1d   : > { %660 = vset.pattern.permute.xlu1 %v738_v5 }
  0x1f   : > { %v241_v6 = vld.sshfl [vmem:[#allocation1 + $0x8] sm:$0xff pattern:$0x75316420]  ;;  %v240_v7 = vld.sshfl [vmem:[#allocation1] sm:$0xff pattern:$0x75316420] }
  0x20   : > { %246 = vrot.lane.b32.xlu1 %v241_v6, %s739_s12  ;;  %244 = vrot.lane.b32.xlu0 %v240_v7, %s739_s12  ;;  %266 = vst [vmem:[#allocation1] ss:$2 sm:$0xff] %v845_v4  ;;  %s599_s12 = sshll.u32 %s804_s22, 4  ;;  %s217_s22 = scalar_lea.vmem [#allocation2], %s590_s11 }
  0x27   : > { %v267_v8 = vld.sshfl [vmem:[#allocation1] sm:$0xff pattern:$0x75316420]  ;;  %v268_v9 = vld.sshfl [vmem:[#allocation1 + $0x8] sm:$0xff pattern:$0x75316420] }
  0x28   : > { %290 = vst [vmem:[#allocation1] ss:$2 sm:$0xff] %v845_v4  ;;  %303 = vperm.xlu1 %660, %v834_v0   ;;  %279 = vperm.xlu0 %658, %v834_v0  }
  0x29   : > { %271 = vrot.lane.b32.xlu2 %v267_v8, %s740_s13 }
  0x2f   : > { %v291_v10 = vld.sshfl [vmem:[#allocation1] sm:$0xff pattern:$0x75316420]  ;;  %v292_v11 = vld.sshfl [vmem:[#allocation1 + $0x8] sm:$0xff pattern:$0x75316420] }
  0x30   : > { %659 = vset.pattern.permute.xlu0 %v737_v3  ;;  %295 = vrot.lane.b32.xlu1 %v291_v10, %s741_s14  ;;  %314 = vst [vmem:[#allocation1] ss:$2 sm:$0xff] %v845_v4 }
  0x31   : > { %230 = vperm.xlu0 %659, %v834_v0   ;;  %661 = vset.pattern.permute.xlu1 %v742_v12 }
  0x32   : > { %273 = vrot.lane.b32.xlu2 %v268_v9, %s740_s13 }
  0x37   : > { %v316_v13 = vld.sshfl [vmem:[#allocation1 + $0x8] sm:$0xff pattern:$0x75316420]  ;;  %v315_v14 = vld.sshfl [vmem:[#allocation1] sm:$0xff pattern:$0x75316420] }
  0x38   : > { %327 = vperm.xlu1 %661, %v834_v0   ;;  %338 = vst [vmem:[#allocation1] ss:$2 sm:$0xff] %v845_v4 }
  0x39   : > { %321 = vrot.lane.b32.xlu0 %v316_v13, %s743_s15 }
  0x3a   : > { %297 = vrot.lane.b32.xlu2 %v292_v11, %s741_s14 }
  0x3f   : > { %v339_v15 = vld.sshfl [vmem:[#allocation1] sm:$0xff pattern:$0x75316420]  ;;  %v340_v16 = vld.sshfl [vmem:[#allocation1 + $0x8] sm:$0xff pattern:$0x75316420] }
  0x40   : > { %662 = vset.pattern.permute.xlu1 %v744_v17  ;;  %362 = vst [vmem:[#allocation1] ss:$2 sm:$0xff] %v845_v4 }
  0x41   : > { %351 = vperm.xlu1 %662, %v834_v0   ;;  %345 = vrot.lane.b32.xlu0 %v340_v16, %s745_s16 }
  0x42   : > { %319 = vrot.lane.b32.xlu2 %v315_v14, %s743_s15  ;;  %s522_s15 = scalar_lea.hbm %s969_s5, %s599_s12 }
  0x47   : > { %v364_v18 = vld.sshfl [vmem:[#allocation1 + $0x8] sm:$0xff pattern:$0x75316420]  ;;  %v363_v19 = vld.sshfl [vmem:[#allocation1] sm:$0xff pattern:$0x75316420] }
  0x48   : > { %386 = vst [vmem:[#allocation1] ss:$2 sm:$0xff] %v845_v4 }
  0x49   : > { %663 = vset.pattern.permute.xlu1 %v746_v20  ;;  %369 = vrot.lane.b32.xlu0 %v364_v18, %s747_s17 }
  0x4a   : > { %375 = vperm.xlu1 %663, %v834_v0   ;;  %343 = vrot.lane.b32.xlu2 %v339_v15, %s745_s16  ;;  %s524_s16 = sshll.u32 %s217_s22, 4  ;;  %s525_s16 = int_to_ptr.vmem [resolvable:$true] %s524_s16 }
  0x4f   : > { %v388_v21 = vld.sshfl [vmem:[#allocation1 + $0x8] sm:$0xff pattern:$0x75316420]  ;;  %v387_v22 = vld.sshfl [vmem:[#allocation1] sm:$0xff pattern:$0x75316420] }
  0x50   : > { %410 = vst [vmem:[#allocation1] ss:$2 sm:$0xff] %v845_v4 }
  0x51   : > { %393 = vrot.lane.b32.xlu0 %v388_v21, %s748_s23 }
  0x52   : > { %664 = vset.pattern.permute.xlu1 %v749_v23  ;;  %367 = vrot.lane.b32.xlu2 %v363_v19, %s747_s17  ;;  %s526_s17 = sshll.u32 %s522_s15, 4  ;;  %s527_s17 = int_to_ptr.hbm [resolvable:$true] %s526_s17 }
  0x53   : > { %399 = vperm.xlu1 %664, %v834_v0  }
  0x57   : > { %v412_v24 = vld.sshfl [vmem:[#allocation1 + $0x8] sm:$0xff pattern:$0x75316420]  ;;  %v411_v27 = vld.sshfl [vmem:[#allocation1] sm:$0xff pattern:$0x75316420] }
  0x59   : > { %417 = vrot.lane.b32.xlu0 %v412_v24, %s750_s25 }
  0x5a   : > { %391 = vrot.lane.b32.xlu2 %v387_v22, %s748_s23  ;;  %s511_s23 = scalar_lea.sflag [#allocation3], %s215_s10 }
  0x5b   : > { %665 = vset.pattern.permute.xlu1 %v751_v25 }
  0x5c   : > { %423 = vperm.xlu1 %665, %v834_v0  }
  0x61   : > { %454 = vperm.xlu0 %659, %v225_v26  }
  0x62   : > { %415 = vrot.lane.b32.xlu2 %v411_v27, %s750_s25  ;;  %s685_s25 = sshra.s32 %s527_s17, 4  ;;  %s686_s25 = int_to_ptr.hbm [resolvable:$true] %s685_s25 }
  0x63   : > { %s687_s26 = scalar_lea.hbm %s686_s25, 16  ;;  %p692_p0 = scmp.lt.s32.totalorder %s686_s25, %s969_s5 }
  0x64   : > { %667 = vset.pattern.permute.xlu1 %v735_v1  ;;  %p688_p11 = scmp.ne.s32.totalorder %s686_s25, %s687_s26  ;;  %p693_p1 = scmp.lt.s32.totalorder %s691_s7, %s687_s26 }
  0x65   : > { %466 = vperm.xlu1 %667, %v225_v26  }
  0x66   : > { %p689_p12 = pnand %p688_p11, %p821_p5  ;;  %p694_p2 = por %p693_p1, %p692_p0 }
  0x68   : > { %p690_p13 = pneg %p689_p12 }
  0x6a   : > { %436 = vperm.xlu2 %666, %v224_v28   ;;  %p695_p3 = pnand %p694_p2, %p690_p13 }
  0x6d   : > { %669 = vset.pattern.permute.xlu1 %v738_v5 }
  0x6e   : > { %494 = vperm.xlu1 %669, %v225_v26  }
  0x72   : > { %668 = vset.pattern.permute.xlu2 %v736_v2 }
  0x73   : > { %480 = vperm.xlu2 %668, %v225_v26  }
  0x7b   : > { %670 = vset.pattern.permute.xlu2 %v737_v3 }
  0x7c   : > { %503 = vperm.xlu2 %670, %v226_v29  }
  0x83   : > { %v272_v30 = vpop.permute.xlu2 %271 }
  0x87   : > { %v255_v31 = vpop.permute.xlu1 %254 }
  0x8c   : > { %v274_v32 = vpop.permute.xlu2 %273 }
  0x8d   : > { %v277_v59 = vsel %vm275_vm1, %v274_v32, %v272_v30  ;;  %v276_v8 = vsel %vm275_vm1, %v272_v30, %v274_v32 }
  0x92   : > { %v247_v33 = vpop.permute.xlu1 %246  ;;  %v245_v34 = vpop.permute.xlu0 %244 }
  0x93   : > { %v252_v51 = vsel %vm250_vm0, %v247_v33, %v245_v34  ;;  %v251_v55 = vsel %vm250_vm0, %v245_v34, %v247_v33 }
  0x94   : > { %v298_v35 = vpop.permute.xlu2 %297  ;;  %v258_v53 = vmul.f32 %v255_v31, %v252_v51  ;;  %v257_v62 = vmul.f32 %v255_v31, %v251_v55 }
  0x96   : > { %v261_v58 = vrot.slane %v258_v53, 4 }
  0x98   : > { %v263_v2 = vsel %vm262_vm4, %v257_v62, %v261_v58 }
  0x9a   : > { %v304_v36 = vpop.permute.xlu1 %303  ;;  %v280_v37 = vpop.permute.xlu0 %279 }
  0x9b   : > { %v283_v61 = vmul.f32 %v280_v37, %v277_v59  ;;  %v282_v10 = vmul.f32 %v280_v37, %v276_v8 }
  0x9c   : > { %v320_v38 = vpop.permute.xlu2 %319 }
  0x9d   : > { %v286_v5 = vrot.slane %v283_v61, 4 }
  0x9f   : > { %v287_v16 = vsel %vm262_vm4, %v282_v10, %v286_v5 }
  0xa2   : > { %v296_v39 = vpop.permute.xlu1 %295 }
  0xa3   : > { %v231_v40 = vpop.permute.xlu0 %230  ;;  %v301_v63 = vsel %vm299_vm2, %v298_v35, %v296_v39  ;;  %v300_v13 = vsel %vm299_vm2, %v296_v39, %v298_v35 }
  0xa4   : > { %v344_v41 = vpop.permute.xlu2 %343  ;;  %v235_v54 = vperm.slane %v231_v40, %v234_v52  ;;  %v307_v6 = vmul.f32 %v304_v36, %v301_v63  ;;  %v306_v24 = vmul.f32 %v304_v36, %v300_v13 }
  0xa6   : > { %v237_v0 = vmul.f32 %v235_v54, %v845_v4  ;;  %v310_v17 = vrot.slane %v307_v6, 4 }
  0xa8   : > { %v265_v9 = vadd.f32 %v263_v2, %v237_v0  ;;  %v311_v29 = vsel %vm262_vm4, %v306_v24, %v310_v17 }
  0xaa   : > { %v328_v43 = vpop.permute.xlu1 %327  ;;  %v289_v22 = vadd.f32 %v287_v16, %v265_v9 }
  0xab   : > { %v322_v44 = vpop.permute.xlu0 %321 }
  0xac   : > { %v368_v46 = vpop.permute.xlu2 %367  ;;  %v325_v1 = vsel %vm323_vm3, %v322_v44, %v320_v38  ;;  %v324_v14 = vsel %vm323_vm3, %v320_v38, %v322_v44  ;;  %v313_v33 = vadd.f32 %v311_v29, %v289_v22 }
  0xad   : > { %v331_v7 = vmul.f32 %v328_v43, %v325_v1  ;;  %v330_v25 = vmul.f32 %v328_v43, %v324_v14 }
  0xaf   : > { %v334_v18 = vrot.slane %v331_v7, 4 }
  0xb1   : > { %v335_v30 = vsel %vm262_vm4, %v330_v25, %v334_v18 }
  0xb2   : > { %v337_v39 = vadd.f32 %v335_v30, %v313_v33 }
  0xb3   : > { %v352_v49 = vpop.permute.xlu1 %351  ;;  %v346_v50 = vpop.permute.xlu0 %345 }
  0xb4   : > { %v392_v57 = vpop.permute.xlu2 %391  ;;  %v349_v3 = vsel %vm347_vm5, %v346_v50, %v344_v41  ;;  %v348_v23 = vsel %vm347_vm5, %v344_v41, %v346_v50 }
  0xb5   : > { %v355_v11 = vmul.f32 %v352_v49, %v349_v3  ;;  %v354_v31 = vmul.f32 %v352_v49, %v348_v23 }
  0xb7   : > { %v358_v26 = vrot.slane %v355_v11, 4 }
  0xb9   : > { %v359_v35 = vsel %vm262_vm4, %v354_v31, %v358_v26 }
  0xba   : > { %v361_v42 = vadd.f32 %v359_v35, %v337_v39 }
  0xbb   : > { %v370_v56 = vpop.permute.xlu0 %369 }
  0xbc   : > { %v376_v60 = vpop.permute.xlu1 %375  ;;  %v373_v4 = vsel %vm371_vm6, %v370_v56, %v368_v46  ;;  %v416_v21 = vpop.permute.xlu2 %415  ;;  %v372_v28 = vsel %vm371_vm6, %v368_v46, %v370_v56 }
  0xbd   : > { %v379_v19 = vmul.f32 %v376_v60, %v373_v4  ;;  %v378_v37 = vmul.f32 %v376_v60, %v372_v28 }
  0xbf   : > { %v382_v32 = vrot.slane %v379_v19, 4 }
  0xc1   : > { %v383_v40 = vsel %vm262_vm4, %v378_v37, %v382_v32 }
  0xc2   : > { %v385_v50 = vadd.f32 %v383_v40, %v361_v42 }
  0xc3   : > { %v394_v12 = vpop.permute.xlu0 %393 }
  0xc4   : > { %v397_v15 = vsel %vm395_vm7, %v394_v12, %v392_v57  ;;  %v396_v34 = vsel %vm395_vm7, %v392_v57, %v394_v12  ;;  %v437_v49 = vpop.permute.xlu2 %436 }
  0xc5   : > { %v400_v20 = vpop.permute.xlu1 %399  ;;  %v441_v45 = vperm.slane %v437_v49, %v234_v52 }
  0xc6   : > { %v403_v27 = vmul.f32 %v400_v20, %v397_v15  ;;  %v402_v41 = vmul.f32 %v400_v20, %v396_v34 }
  0xc8   : > { %v406_v36 = vrot.slane %v403_v27, 4 }
  0xca   : > { %v407_v46 = vsel %vm262_vm4, %v402_v41, %v406_v36 }
  0xcb   : > { %v418_v38 = vpop.permute.xlu0 %417  ;;  %v409_v55 = vadd.f32 %v407_v46, %v385_v50 }
  0xcc   : > { %v421_v43 = vsel %vm419_vm8, %v418_v38, %v416_v21  ;;  %v420_v51 = vsel %vm419_vm8, %v416_v21, %v418_v38 }
  0xcd   : > { %v481_v61 = vpop.permute.xlu2 %480 }
  0xce   : > { %v424_v44 = vpop.permute.xlu1 %423 }
  0xcf   : > { %v427_v47 = vmul.f32 %v424_v44, %v421_v43  ;;  %v426_v53 = vmul.f32 %v424_v44, %v420_v51 }
  0xd1   : > { %v430_v54 = vrot.slane %v427_v47, 4 }
  0xd3   : > { %v431_v56 = vsel %vm262_vm4, %v426_v53, %v430_v54  ;;  %v455_v9 = vpop.permute.xlu0 %454 }
  0xd4   : > { %v433_v57 = vadd.f32 %v431_v56, %v409_v55 }
  0xd6   : > { %v443_v58 = vadd.f32 %v441_v45, %v433_v57  ;;  %v504_v26 = vpop.permute.xlu2 %503 }
  0xd7   : > { %v467_v59 = vpop.permute.xlu1 %466 }
  0xd8   : > { %v444_v60 = vmax.f32 %v443_v58, 0.0 }
  0xda   : > { %v446_v62 = vperm.slane %v444_v60, 0  ;;  %v447_v63 = vperm.slane %v444_v60, 4  ;;  %v459_v0 = vperm.slane %v444_v60, 1  ;;  %v460_v1 = vperm.slane %v444_v60, 5 }
  0xdb   : > { %v473_v2 = vperm.slane %v444_v60, 2  ;;  %v474_v3 = vperm.slane %v444_v60, 6  ;;  %v487_v5 = vperm.slane %v444_v60, 3  ;;  %v488_v6 = vperm.slane %v444_v60, 7 }
  0xdc   : > { %v450_v48 = vperm.slane %v446_v62, 0  ;;  %v451_v52 = vperm.slane %v447_v63, 0  ;;  %v463_v7 = vperm.slane %v459_v0, 1  ;;  %v464_v8 = vperm.slane %v460_v1, 1 }
  0xdd   : > { %v477_v4 = vperm.slane %v473_v2, 2  ;;  %v478_v10 = vperm.slane %v474_v3, 2  ;;  %v491_v15 = vperm.slane %v487_v5, 3  ;;  %v492_v16 = vperm.slane %v488_v6, 3 }
  0xde   : > { %v457_v11 = vmul.f32 %v455_v9, %v450_v48  ;;  %v458_v12 = vmul.f32 %v455_v9, %v451_v52  ;;  %v469_v13 = vmul.f32 %v467_v59, %v463_v7  ;;  %v470_v14 = vmul.f32 %v467_v59, %v464_v8 }
  0xdf   : > { %v483_v19 = vmul.f32 %v481_v61, %v477_v4  ;;  %v484_v20 = vmul.f32 %v481_v61, %v478_v10 }
  0xe0   : > { %v471_v17 = vadd.f32 %v469_v13, %v457_v11  ;;  %v472_v18 = vadd.f32 %v470_v14, %v458_v12  ;;  %v495_v21 = vpop.permute.xlu1 %494 }
  0xe1   : > { %v497_v22 = vmul.f32 %v495_v21, %v491_v15  ;;  %v498_v23 = vmul.f32 %v495_v21, %v492_v16 }
  0xe2   : > { %v485_v24 = vadd.f32 %v483_v19, %v471_v17  ;;  %v486_v25 = vadd.f32 %v484_v20, %v472_v18 }
  0xe4   : > { %v499_v27 = vadd.f32 %v497_v22, %v485_v24  ;;  %v500_v28 = vadd.f32 %v498_v23, %v486_v25 }
  0xe6   : > { %v506_v29 = vadd.f32 %v504_v26, %v499_v27  ;;  %v507_v30 = vadd.f32 %v504_v26, %v500_v28 }
  0xe8   : > { %508 = vst [vmem:[%s217_s22] sm:$0xff] %v506_v29 }
  0xe9   : > { %509 = vst [vmem:[%s217_s22 + $0x8] sm:$0xff] %v507_v30 }
  0xea   : > { %698 = shalt.err (!%p695_p3)
}
  0xeb   : > { %600 = dma.vmem_to_hbm [thread:$0]  (%p821_p5), %s525_s16, 256, %s527_s17, %s511_s23  }
  0xec PF: > { %p606_p4 = scmp.ge.s32.totalorder %s733_s21, 2  ;;  %s538_s10 = sand.u32 1, %s721_s18  }
  0xed   : > { %s539_s11 = scalar_lea.sflag [#allocation3], %s538_s10 }
  0xee   : > { %p603_p7 = pnand %p606_p4, %p825_p6 }
  0xf0   : > { %p604_p8 = pneg %p603_p7 }
  0xf2   : > { %716 = dma.done.wait (%p604_p8), %s539_s11, 256  }
  0xf3   : > { %718 = vsyncadd (%p604_p8), %s539_s11, 4294967040  ;;  %p15_p9 = scmp.ge.s32.totalorder %s808_s24, 4   ;;  %s972_s18 = smov %s725_s19 }
  0xf4   : > { %s973_s19 = smov %s729_s20  ;;  %s974_s20 = smov %s819_s27 }
  0xf5   : > { %s975_s21 = smov %s808_s24  ;;  %17 = sbr.rel (!%p15_p9) target bundleno = 3 (0x3), region = 75 }
  0xfa   :  { %545 = vsyncpa [#allocation3], 1 }
  0xfb   :  { %547 = vsyncpa [#allocation3 + $0x1], 1 }

</bundles_post_ra>
